<compile_context>
chip_gen: v6e
topology: v6e:2x2x1
jax: 0.10.0
libtpu: 0.0.40
codegen_flags: <defaults>
</compile_context>

<pallas_src>
import jax
import jax.numpy as jnp
from jax.experimental import pallas as pl
from jax.experimental.pallas import tpu as pltpu

IN_FEATURES = 11 + 8 * 4   # 43
HIDDEN = 256
OUT_FEATURES = 3
OUT_PAD = 128              # lane-dense padded output width


def qnet_kernel(x_ref, w1_ref, b1_ref, w2_ref, b2_ref, o_ref):
    # Whole problem (or one batch tile) is resident in VMEM.
    x = x_ref[...]                       # (bm, 43)   bf16 (or f32)
    w1 = w1_ref[...]                     # (43, 256)  bf16 (or f32)
    b1 = b1_ref[...]                     # (1, 256)   f32
    w2 = w2_ref[...]                     # (256, 128) bf16 (or f32), cols 3..127 are zero
    b2 = b2_ref[...]                     # (1, 128)   f32, cols 3..127 are zero

    # linear1 + ReLU: MXU matmul with f32 accumulate; bias add / ReLU stay in f32.
    h = jnp.dot(x, w1, preferred_element_type=jnp.float32) + b1
    h = jnp.maximum(h, 0.0)

    # linear2 (lane-dense 128-wide output slab -> unmasked stores).
    out = jnp.dot(h.astype(w2.dtype), w2, preferred_element_type=jnp.float32) + b2
    o_ref[...] = out.astype(o_ref.dtype)


def linear_qnet_forward(x, w1, b1, w2, b2, *, use_bf16=True, block_batch=256):
    """x: (B, 43); w1: (43, 256); b1: (256,); w2: (256, 3); b2: (3,). Returns (B, 3) f32."""
    batch = x.shape[0]
    compute_dtype = jnp.bfloat16 if use_bf16 else jnp.float32

    xc = x.astype(compute_dtype)
    w1c = w1.astype(compute_dtype)
    b1r = b1.reshape(1, HIDDEN).astype(jnp.float32)

    # Zero-pad second layer to a lane-dense 128-wide output.
    w2p = jnp.zeros((HIDDEN, OUT_PAD), compute_dtype)
    w2p = w2p.at[:, :OUT_FEATURES].set(w2.astype(compute_dtype))
    b2p = jnp.zeros((1, OUT_PAD), jnp.float32)
    b2p = b2p.at[0, :OUT_FEATURES].set(b2.astype(jnp.float32))

    if batch <= block_batch:
        # Grid-less single-block kernel: everything lives in VMEM, no pipeline overhead.
        out = pl.pallas_call(
            qnet_kernel,
            out_shape=jax.ShapeDtypeStruct((batch, OUT_PAD), jnp.float32),
            in_specs=[pl.BlockSpec(memory_space=pltpu.MemorySpace.VMEM)] * 5,
            out_specs=pl.BlockSpec(memory_space=pltpu.MemorySpace.VMEM),
        )(xc, w1c, b1r, w2p, b2p)
        return out[:, :OUT_FEATURES]

    # Large-batch path: tile over batch, keep weights VMEM-resident across tiles.
    num_tiles = pl.cdiv(batch, block_batch)
    padded = num_tiles * block_batch
    if padded != batch:
        xc = jnp.pad(xc, ((0, padded - batch), (0, 0)))

    out = pl.pallas_call(
        qnet_kernel,
        out_shape=jax.ShapeDtypeStruct((padded, OUT_PAD), jnp.float32),
        grid=(num_tiles,),
        in_specs=[
            pl.BlockSpec((block_batch, IN_FEATURES), lambda i: (i, 0)),
            pl.BlockSpec((IN_FEATURES, HIDDEN), lambda i: (0, 0)),
            pl.BlockSpec((1, HIDDEN), lambda i: (0, 0)),
            pl.BlockSpec((HIDDEN, OUT_PAD), lambda i: (0, 0)),
            pl.BlockSpec((1, OUT_PAD), lambda i: (0, 0)),
        ],
        out_specs=pl.BlockSpec((block_batch, OUT_PAD), lambda i: (i, 0)),
        compiler_params=pltpu.CompilerParams(
            dimension_semantics=("parallel",),   # shards batch tiles across TCs on v7x
        ),
    )(xc, w1c, b1r, w2p, b2p)
    return out[:batch, :OUT_FEATURES]


def ref_forward(x, w1, b1, w2, b2, *, use_bf16=True):
    """Pure-JAX reference with the same precision recipe as the kernel."""
    cd = jnp.bfloat16 if use_bf16 else jnp.float32
    h = jnp.dot(x.astype(cd), w1.astype(cd), preferred_element_type=jnp.float32) + b1
    h = jnp.maximum(h, 0.0)
    return jnp.dot(h.astype(cd), w2.astype(cd), preferred_element_type=jnp.float32) + b2


def init_params(key):
    # Mirrors nn.Linear default init: U(-1/sqrt(fan_in), 1/sqrt(fan_in)).
    k1, k2, k3, k4 = jax.random.split(key, 4)
    bound1 = 1.0 / jnp.sqrt(jnp.float32(IN_FEATURES))
    bound2 = 1.0 / jnp.sqrt(jnp.float32(HIDDEN))
    w1 = jax.random.uniform(k1, (IN_FEATURES, HIDDEN), jnp.float32, -bound1, bound1)
    b1 = jax.random.uniform(k2, (HIDDEN,), jnp.float32, -bound1, bound1)
    w2 = jax.random.uniform(k3, (HIDDEN, OUT_FEATURES), jnp.float32, -bound2, bound2)
    b2 = jax.random.uniform(k4, (OUT_FEATURES,), jnp.float32, -bound2, bound2)
    return w1, b1, w2, b2


if __name__ == "__main__":
    key = jax.random.PRNGKey(0)
    pkey, xkey1, xkey2 = jax.random.split(key, 3)
    w1, b1, w2, b2 = init_params(pkey)

    # --- small batch (grid-less single-block path) ---
    batch = 8
    x = jax.random.normal(xkey1, (batch, IN_FEATURES), jnp.float32)
    out = jax.block_until_ready(linear_qnet_forward(x, w1, b1, w2, b2))
    assert out.shape == (batch, OUT_FEATURES)

    ref_mixed = ref_forward(x, w1, b1, w2, b2, use_bf16=True)
    ref_f32 = jnp.maximum(x @ w1 + b1, 0.0) @ w2 + b2
    assert jnp.allclose(out, ref_mixed, atol=1e-3, rtol=1e-3)
    assert jnp.allclose(out, ref_f32, atol=2e-2, rtol=2e-2)

    # --- larger batch (batch-tiled path, exercises padding + parallel grid) ---
    batch2 = 384
    x2 = jax.random.normal(xkey2, (batch2, IN_FEATURES), jnp.float32)
    out2 = jax.block_until_ready(
        linear_qnet_forward(x2, w1, b1, w2, b2, block_batch=256)
    )
    assert out2.shape == (batch2, OUT_FEATURES)

    ref2_mixed = ref_forward(x2, w1, b1, w2, b2, use_bf16=True)
    ref2_f32 = jnp.maximum(x2 @ w1 + b1, 0.0) @ w2 + b2
    assert jnp.allclose(out2, ref2_mixed, atol=1e-3, rtol=1e-3)
    assert jnp.allclose(out2, ref2_f32, atol=2e-2, rtol=2e-2)

    print("KERNEL_OK")
</pallas_src>

<mosaic_0001>
module attributes {stable_mosaic.version = 11 : i64} {
  func.func @qnet_kernel(%arg0: memref<8x43xbf16, #tpu.memory_space<vmem>>, %arg1: memref<43x256xbf16, #tpu.memory_space<vmem>>, %arg2: memref<1x256xf32, #tpu.memory_space<vmem>>, %arg3: memref<256x128xbf16, #tpu.memory_space<vmem>>, %arg4: memref<1x128xf32, #tpu.memory_space<vmem>>, %arg5: memref<8x128xf32, #tpu.memory_space<vmem>>) attributes {dimension_semantics = [], scalar_prefetch = 0 : i64, scratch_operands = 0 : i64, tpu.core_type = #tpu.core_type<tc>} {
    %c0 = arith.constant 0 : index
    %c0_0 = arith.constant 0 : index
    %0 = vector.load %arg0[%c0, %c0_0] : memref<8x43xbf16, #tpu.memory_space<vmem>>, vector<8x43xbf16>
    %c0_1 = arith.constant 0 : index
    %c0_2 = arith.constant 0 : index
    %1 = vector.load %arg1[%c0_1, %c0_2] : memref<43x256xbf16, #tpu.memory_space<vmem>>, vector<43x256xbf16>
    %c0_3 = arith.constant 0 : index
    %c0_4 = arith.constant 0 : index
    %2 = vector.load %arg2[%c0_3, %c0_4] : memref<1x256xf32, #tpu.memory_space<vmem>>, vector<1x256xf32>
    %c0_5 = arith.constant 0 : index
    %c0_6 = arith.constant 0 : index
    %3 = vector.load %arg3[%c0_5, %c0_6] : memref<256x128xbf16, #tpu.memory_space<vmem>>, vector<256x128xbf16>
    %c0_7 = arith.constant 0 : index
    %c0_8 = arith.constant 0 : index
    %4 = vector.load %arg4[%c0_7, %c0_8] : memref<1x128xf32, #tpu.memory_space<vmem>>, vector<1x128xf32>
    %cst = arith.constant dense<0.000000e+00> : vector<8x256xf32>
    %5 = tpu.matmul %0, %1, %cst {dimension_numbers = #tpu.dot_dimension_numbers<[1], [0], [0], [1], [0, 0, 1, 1], [], []>} : vector<8x43xbf16>, vector<43x256xbf16>, vector<8x256xf32> -> vector<8x256xf32>
    %6 = vector.broadcast %2 : vector<1x256xf32> to vector<8x256xf32>
    %7 = arith.addf %5, %6 : vector<8x256xf32>
    %cst_9 = arith.constant 0.000000e+00 : f32
    %8 = vector.broadcast %cst_9 : f32 to vector<8x256xf32>
    %9 = arith.maximumf %7, %8 : vector<8x256xf32>
    %10 = arith.truncf %9 : vector<8x256xf32> to vector<8x256xbf16>
    %cst_10 = arith.constant dense<0.000000e+00> : vector<8x128xf32>
    %11 = tpu.matmul %10, %3, %cst_10 {dimension_numbers = #tpu.dot_dimension_numbers<[1], [0], [0], [1], [0, 0, 1, 1], [], []>} : vector<8x256xbf16>, vector<256x128xbf16>, vector<8x128xf32> -> vector<8x128xf32>
    %12 = vector.broadcast %4 : vector<1x128xf32> to vector<8x128xf32>
    %13 = arith.addf %11, %12 : vector<8x128xf32>
    %c0_11 = arith.constant 0 : index
    %c0_12 = arith.constant 0 : index
    %14 = vector.load %arg5[%c0_11, %c0_12] : memref<8x128xf32, #tpu.memory_space<vmem>>, vector<8x128xf32>
    tpu.vector_store %arg5[%c0_11, %c0_12], %13 {strides = array<i32>} : memref<8x128xf32, #tpu.memory_space<vmem>>, vector<8x128xf32>,
    return
  }
}

</mosaic_0001>

<bundles_post_ra>
// kernel: tpu_custom_call.1
= control target key start
LH: loop header
LB: loop body
LE: loop exit
PB: predicated region body
PF: predicated region fallthrough
CT: control target
= control target key end

     0   :  { %10 = vsyncpa [#allocation3], 0  ;;  %s584_s0 = inlined_call_operand.hbm [shape: bf16[8,43], index: 0, kind: input, shape index: {}]   ;;  %s585_s1 = inlined_call_operand.hbm [shape: bf16[43,256], index: 1, kind: input, shape index: {}]   ;;  %s586_s2 = inlined_call_operand.vmem [shape: f32[1,256], index: 2, kind: input, shape index: {}]   ;;  %s587_s3 = inlined_call_operand.hbm [shape: bf16[256,128], index: 3, kind: input, shape index: {}]   ;;  %s588_s4 = inlined_call_operand.vmem [shape: f32[1,128], index: 4, kind: input, shape index: {}]   ;;  %s589_s5 = inlined_call_operand.hbm [shape: f32[8,128], index: 5, kind: output, shape index: {}]  }
   0x1   :  { %11 = vsyncpa [#allocation6], 0 }
   0x2   :  { %12 = vsyncpa [#allocation4], 0  ;;  %s526_s18 = smov [#allocation5]  }
   0x3   :  { %s28_s19 = sshll.u32 %s526_s18, 4  ;;  %s29_s19 = int_to_ptr.vmem [resolvable:$true] %s28_s19 }
   0x4   :  { %s448_s20 = scalar_lea.vmem %s29_s19, 768  ;;  %p453_p1 = scmp.lt.s32.totalorder %s29_s19, %s29_s19 }
   0x5   :  { %p449_p0 = scmp.ne.s32.totalorder %s29_s19, %s448_s20  ;;  %p454_p2 = scmp.lt.s32.totalorder %s448_s20, %s448_s20 }
   0x7   :  { %p455_p3 = por %p454_p2, %p453_p1 }
   0x9   :  { %p456_p4 = pnand %p455_p3, %p449_p0 }
   0xb   :  { %459 = shalt.err (!%p456_p4)
}
   0xc   :  { %s527_s21 = smov 128   ;;  %s528_s22 = smov 8  }
   0xd   :  { %34 = dma.hbm_to_vmem [thread:$0]  %s585_s1, 768, %s29_s19, [#allocation6], %s527_s21, %s527_s21, %s528_s22  }
   0xe   :  { %s529_s25 = smov [#allocation2]   ;;  %s530_s27 = smov [#allocation7]  }
   0xf   :  { %s19_s26 = sshll.u32 %s529_s25, 4  ;;  %s42_s28 = sshll.u32 %s530_s27, 4  ;;  %s20_s26 = int_to_ptr.vmem [resolvable:$true] %s19_s26  ;;  %s43_s28 = int_to_ptr.vmem [resolvable:$true] %s42_s28 }
  0x10   :  { %s468_s29 = scalar_lea.vmem %s20_s26, 64  ;;  %p473_p6 = scmp.lt.s32.totalorder %s20_s26, %s20_s26 }
  0x11   :  { %p469_p5 = scmp.ne.s32.totalorder %s20_s26, %s468_s29  ;;  %p474_p7 = scmp.lt.s32.totalorder %s468_s29, %s468_s29 }
  0x13   :  { %p475_p8 = por %p474_p7, %p473_p6 }
  0x15   :  { %p476_p9 = pnand %p475_p8, %p469_p5 }
  0x17   :  { %479 = shalt.err (!%p476_p9)
}
  0x18   :  { %22 = dma.hbm_to_vmem [thread:$0]  %s584_s0, 64, %s20_s26, [#allocation3]  }
  0x19   :  { %s488_s7 = scalar_lea.vmem %s43_s28, 2048  ;;  %p493_p11 = scmp.lt.s32.totalorder %s43_s28, %s43_s28 }
  0x1a   :  { %p489_p10 = scmp.ne.s32.totalorder %s43_s28, %s488_s7  ;;  %p494_p12 = scmp.lt.s32.totalorder %s488_s7, %s488_s7 }
  0x1c   :  { %p495_p13 = por %p494_p12, %p493_p11 }
  0x1e   :  { %p496_p0 = pnand %p495_p13, %p489_p10 }
  0x20   :  { %499 = shalt.err (!%p496_p0)
}
  0x21   :  { %s531_s1 = smov 64   ;;  %s532_s8 = smov 4  }
  0x22   :  { %48 = dma.hbm_to_vmem [thread:$0]  %s587_s3, 2048, %s43_s28, [#allocation6], %s531_s1, %s531_s1, %s532_s8  }
  0x23   :  { %520 = dma.done.wait [#allocation3], 64  }
  0x24   :  { %521 = vsyncadd [#allocation3], 4294967232 }
  0x25   :  { %522 = dma.done.wait [#allocation6], 2816  }
  0x26   :  { %523 = vsyncadd [#allocation6], 4294964480  ;;  %vm145_vm0 = vcmask 1044480   ;;  %v533_v0 = vmov 0   ;;  %vm146_vm1 = vcmask 1045504   ;;  %v534_v1 = vmov 65535  }
  0x27   :  { %187 = vmatprep.mubr.bf16.mxu0 %v533_v0  ;;  %v147_v2 = vsel %vm145_vm0, 4294967295, %v534_v1  ;;  %v415_v4 = vld [vmem:[#allocation5 + $0x24] ss:$8 sps:$4 sm:$0x3f]   ;;  %v418_v7 = vld [vmem:[#allocation5 + $0x14] ss:$8 sps:$4 sm:$0xff]   ;;  %v103_v29 = vlaneseq }
  0x28   :  { %v148_v3 = vsel %vm146_vm1, %v147_v2, 0  ;;  %v417_v5 = vld [vmem:[#allocation5 + $0x20] ss:$8 sps:$4 sm:$0x3f]   ;;  %v420_v9 = vld [vmem:[#allocation5 + $0x10] ss:$8 sps:$4 sm:$0xff]  }
  0x29   :  { %v153_v6 = vand.u32 %v415_v4, %v148_v3  ;;  %v150_v8 = vand.u32 %v417_v5, %v148_v3  ;;  %v421_v10 = vld [vmem:[#allocation5 + $0x4] ss:$8 sps:$4 sm:$0xff]   ;;  %v423_v13 = vld [vmem:[#allocation5] ss:$8 sps:$4 sm:$0xff]   ;;  %v428_v16 = vld [vmem:[#allocation7 + $0x68] sm:$0xff]   ;;  %vm141_vm2 = vcmask 351232  }
  0x2a   :  { %v424_v11 = vld [vmem:[#allocation7 + $0x78] sm:$0xff]   ;;  %v426_v14 = vld [vmem:[#allocation7 + $0x70] sm:$0xff]   ;;  %v61_v17 = vld [vmem:[#allocation2] sm:$0xf]  ;;  %v104_v30 = vshrl.u32 %v103_v29, 7 }
  0x2b   :  { %165 = vmatprep.subr.bf16.mxu0 %v153_v6  ;;  %v425_v12 = vld [vmem:[#allocation7 + $0x38] sm:$0xff]   ;;  %383 = vmatprep.subr.bf16.mxu1 %v424_v11  ;;  %v427_v15 = vld [vmem:[#allocation7 + $0x30] sm:$0xff]   ;;  %v429_v18 = vld [vmem:[#allocation7 + $0x28] sm:$0xff]  }
  0x2c   :  { %166 = vmatpush1.bf16.msra.mxu0 %v150_v8  ;;  %384 = vmatpush3.bf16.msra.mxu1 %v425_v12  ;;  %v430_v19 = vld [vmem:[#allocation7 + $0x60] sm:$0xff]   ;;  %v432_v21 = vld [vmem:[#allocation7 + $0x58] sm:$0xff]   ;;  %v434_v23 = vld [vmem:[#allocation7 + $0x50] sm:$0xff]   ;;  %v105_v31 = vsub.s32 0, %v104_v30  ;;  %v109_v33 = vsub.s32 1, %v104_v30 }
  0x2d   :  { %167 = vmatprep.subr.bf16.mxu0 %v418_v7  ;;  %385 = vmatprep.subr.bf16.mxu1 %v426_v14  ;;  %v431_v20 = vld [vmem:[#allocation7 + $0x20] sm:$0xff]   ;;  %v433_v22 = vld [vmem:[#allocation7 + $0x18] sm:$0xff]   ;;  %v435_v24 = vld [vmem:[#allocation7 + $0x10] sm:$0xff]  }
  0x2e   :  { %v436_v25 = vld [vmem:[#allocation7 + $0x48] sm:$0xff]   ;;  %v438_v27 = vld [vmem:[#allocation7 + $0x40] sm:$0xff]  }
  0x2f   :  { %v437_v26 = vld [vmem:[#allocation7 + $0x8] sm:$0xff]   ;;  %v439_v28 = vld [vmem:[#allocation7] sm:$0xff]  }
  0x30   :  { %168 = vmatpush1.bf16.msra.mxu0 %v420_v9  ;;  %386 = vmatpush3.bf16.msra.mxu1 %v427_v15  ;;  %v68_v32 = vld [vmem:[%s586_s2] sm:$0x3]  ;;  %s535_s2 = smov [#allocation8]  }
  0x31   :  { %169 = vmatprep.subr.bf16.mxu0 %v421_v10  ;;  %387 = vmatprep.subr.bf16.mxu1 %v428_v16  ;;  %v106_v34 = vrot.slane %v68_v32, %v105_v31  ;;  %v110_v35 = vrot.slane %v68_v32, %v109_v33  ;;  %v366_v47 = vld [vmem:[%s588_s4] ss:$0 sm:$0xff]  ;;  %s349_s13 = sshll.u32 %s535_s2, 4  ;;  %s350_s13 = int_to_ptr.vmem [resolvable:$true] %s349_s13 }
  0x32   :  { %s500_s14 = scalar_lea.vmem %s350_s13, 128  ;;  %p505_p2 = scmp.lt.s32.totalorder %s350_s13, %s350_s13 }
  0x33   :  { %p501_p1 = scmp.ne.s32.totalorder %s350_s13, %s500_s14  ;;  %p506_p3 = scmp.lt.s32.totalorder %s500_s14, %s500_s14 }
  0x34   :  { %170 = vmatpush1.bf16.msra.mxu0 %v423_v13  ;;  %388 = vmatpush3.bf16.msra.mxu1 %v429_v18 }
  0x35   :  { %389 = vmatprep.subr.bf16.mxu1 %v430_v19  ;;  %p507_p4 = por %p506_p3, %p505_p2 }
  0x37   :  { %365 = vmatmul.mubr.msk.bf16.vlgmr.msra.gmra.mxu0 %vm141_vm2, %v61_v17  ;;  %p508_p5 = pnand %p507_p4, %p501_p1 }
  0x38   :  { %390 = vmatpush3.bf16.msra.mxu1 %v431_v20 }
  0x39   :  { %391 = vmatprep.subr.bf16.mxu1 %v432_v21 }
  0x3c   :  { %392 = vmatpush3.bf16.msra.mxu1 %v433_v22 }
  0x3d   :  { %393 = vmatprep.subr.bf16.mxu1 %v434_v23 }
  0x40   :  { %394 = vmatpush3.bf16.msra.mxu1 %v435_v24 }
  0x41   :  { %395 = vmatprep.subr.bf16.mxu1 %v436_v25 }
  0x44   :  { %396 = vmatpush3.bf16.msra.mxu1 %v437_v26 }
  0x45   :  { %397 = vmatprep.subr.bf16.mxu1 %v438_v27 }
  0x48   :  { %398 = vmatpush3.bf16.msra.mxu1 %v439_v28 }
  0xf7   :  { %v189_v36 = vpop.f32.mrf.mxu0 }
  0xf8   :  { %v190_v37 = vadd.f32 %v189_v36, %v106_v34 }
  0xf9   :  { %v191_v38 = vpop.f32.mrf.mxu0 }
  0xfa   :  { %v192_v39 = vadd.f32 %v191_v38, %v110_v35  ;;  %v196_v40 = vmax.f32 %v190_v37, 0.0 }
  0xfb   :  { %v193_v41 = vpop.f32.mrf.mxu0 }
  0xfc   :  { %v197_v42 = vmax.f32 %v192_v39, 0.0  ;;  %v198_v45 = vpack.c.bf16 %v196_v40, %v196_v40 }
  0xfd   :  { %v194_v43 = vpop.f32.mrf.mxu0 }
  0xfe   :  { %v199_v44 = vpack.c.bf16 %v197_v42, %v197_v42 }
 0x100   :  { %334 = vmatprep.mubr.bf16.mxu1 %v199_v44 }
 0x101   :  { %335 = vmatmul.mubr.bf16.vlgmr.msra.gmra.mxu1 %v198_v45 }
 0x1c1   :  { %v399_v46 = vpop.f32.mrf.mxu1 }
 0x1c3   :  { %v400_v48 = vpop.f32.mrf.mxu1 }
 0x1c4   :  { %v401_v49 = vadd.f32 %v400_v48, %v399_v46 }
 0x1c5   :  { %v402_v50 = vpop.f32.mrf.mxu1 }
 0x1c6   :  { %v337_v51 = vadd.f32 %v401_v49, %v366_v47 }
 0x1c7   :  { %v403_v52 = vpop.f32.mrf.mxu1 }
 0x1c8   :  { %342 = vst [vmem:[#allocation8] sm:$0xff] %v337_v51 }
 0x1c9   :  { %511 = shalt.err (!%p508_p5)
}
 0x1ca   :  { %352 = dma.vmem_to_hbm [thread:$0]  %s350_s13, 128, %s589_s5, [#allocation4]  }
 0x1cb   :  { %524 = dma.done.wait [#allocation4], 128  }
 0x1cc   :  { %525 = vsyncadd [#allocation4], 4294967168 }
 0x1cd   :  { %356 = vsyncpa [#allocation3], 1 }
 0x1ce   :  { %357 = vsyncpa [#allocation6], 1 }
 0x1cf   :  { %358 = vsyncpa [#allocation4], 1 }

</bundles_post_ra>
